<compile_context>
chip_gen: v6e
topology: v6e:2x2x1
jax: 0.10.0
libtpu: 0.0.40
codegen_flags: <defaults>
</compile_context>

<pallas_src>
from functools import partial

import jax
import jax.numpy as jnp
import numpy as np
from jax.experimental import pallas as pl
from jax.experimental.pallas import tpu as pltpu


def self_attention_kernel(x_ref, wqkv_ref, wc_ref, bc_ref, o_ref, *,
                          heads, mxu_dtype, approx_recip, fuse_conv_taps):
    Bt, L, E = x_ref.shape
    hd = E // heads
    R = Bt * L                  # tokens in this block (MXU M dimension)
    G = Bt * heads              # (batch, head) groups

    x2 = x_ref[...].reshape(R, E).astype(mxu_dtype)

    # ---- Fused Q/K/V projection: one wide (E, 3E) matmul; weights are
    # pre-transposed (and Q pre-scaled by 1/sqrt(head_dim)) in the wrapper. ----
    qkv = jnp.dot(x2, wqkv_ref[...], preferred_element_type=jnp.float32)  # (R,3E) f32

    # ---- Per-(batch, head) lane mask built in-kernel (no mask input DMA).
    # Group (b, h) owns lanes [h*hd, (h+1)*hd).  Only iota/mul/add/compare. ----
    hsel = jax.lax.broadcasted_iota(jnp.int32, (Bt, heads, 1, E), 1)
    lane = jax.lax.broadcasted_iota(jnp.int32, (Bt, heads, 1, E), 3)
    lo = hsel * hd
    head_mask = ((lane >= lo) & (lane < lo + hd)).astype(mxu_dtype).reshape(G, 1, E)

    # Replicate activations across the head axis in the (narrow) MXU dtype so
    # the replicated intermediates cost half the VMEM/vregs of f32; the
    # wrapper's batch_block budget accounts for the remaining heads-fold.
    def to_groups(y):           # (R, E) f32 -> (G, L, E) mxu_dtype
        y = y.astype(mxu_dtype)
        return jnp.broadcast_to(y.reshape(Bt, 1, L, E),
                                (Bt, heads, L, E)).reshape(G, L, E)

    q_g = to_groups(qkv[:, :E]) * head_mask      # only head-h lanes survive
    k_g = to_groups(qkv[:, E:2 * E])             # full K; masked Q restricts contraction
    v_g = to_groups(qkv[:, 2 * E:]) * head_mask  # head outputs -> disjoint lane blocks

    # ---- Batched attention over all (batch, head) groups: one MXU sequence,
    # no per-head matmul loop, no in-kernel K transpose. ----
    s = jnp.einsum('gqe,gke->gqk', q_g, k_g,
                   preferred_element_type=jnp.float32)               # (G, L, L)
    s = s - jnp.max(s, axis=-1, keepdims=True)
    p = jnp.exp(s)
    l_sum = jnp.sum(p, axis=-1, keepdims=True)                       # (G, L, 1)
    o_g = jnp.einsum('gqk,gke->gqe', p.astype(mxu_dtype), v_g,
                     preferred_element_type=jnp.float32)             # (G, L, E)
    # Deferred softmax normalization; approx recip runs on the otherwise-idle EUP.
    o_g = o_g * pl.reciprocal(l_sum, approx=approx_recip)

    # Heads occupy disjoint lane blocks of each group, so summing the head
    # axis reproduces the torch concatenate as plain VPU adds.
    o4 = o_g.reshape(Bt, heads, L, E)
    m = o4[:, 0]
    for h in range(1, heads):
        m = m + o4[:, h]
    m = m.reshape(R, E)                                              # == torch "M"

    # ---- Conv1d(kernel=3, padding=1) along the sequence.  OOB rows are
    # masked to zero (also kills cross-batch roll wraparound). ----
    t = jax.lax.broadcasted_iota(jnp.int32, (Bt, L, E), 1).reshape(R, E)
    m_prev = jnp.where(t >= 1, jnp.roll(m, 1, axis=0), 0.0)          # M[t-1]
    m_next = jnp.where(t <= L - 2, jnp.roll(m, -1, axis=0), 0.0)     # M[t+1]
    if fuse_conv_taps:
        # v6e/v7x: K=3E packs into 2 passes of the 256-deep MXU.
        m_stack = jnp.concatenate([m_prev, m, m_next], axis=-1).astype(mxu_dtype)
        out = jnp.dot(m_stack, wc_ref[...], preferred_element_type=jnp.float32)
    else:
        # v5e: K=3E is 3 full 128-deep passes either way; three accumulating
        # matmuls avoid materializing the (R, 3E) lane-concat slab.
        out = (jnp.dot(m_prev.astype(mxu_dtype), wc_ref[0 * E:1 * E, :],
                       preferred_element_type=jnp.float32)
               + jnp.dot(m.astype(mxu_dtype), wc_ref[1 * E:2 * E, :],
                         preferred_element_type=jnp.float32)
               + jnp.dot(m_next.astype(mxu_dtype), wc_ref[2 * E:3 * E, :],
                         preferred_element_type=jnp.float32))
    out = out + bc_ref[...]

    # nn.Dropout(p=0.1) in eval mode is identity (inference semantics).
    o_ref[...] = out.reshape(Bt, L, E).astype(o_ref.dtype)


def _pick_batch_block(B, L, E, heads, itemsize):
    """Grid/VMEM sizing per the perf review.

    * Fill the MXU M dimension: target R = batch_block*L of ~256 rows.
    * Stay inside a ~40 MiB VMEM budget so the kernel fits v7x's 64 MiB
      (well below v5e/v6e's 128 MiB).
    * Keep >= 2 grid steps whenever the batch allows it so
      dimension_semantics=("parallel",) can shard across v7x's two
      TensorCores; on single-TC chips the extra steps just pipeline.
    """
    target_rows = 256
    bb = min(B, max(1, -(-target_rows // L)))     # ceil(target/L), capped at B

    def vmem_bytes(bb_):
        R, G = bb_ * L, bb_ * heads
        attn = (4 * G * L * E + 2 * G * L * L) * itemsize   # q/k/v/o + s/p (MXU dtype)
        conv = 4 * R * E * 4 + 3 * R * E * itemsize         # m, shifted copies, stack
        stats = 2 * G * L * 4                               # softmax max / row-sum
        io = 2 * 2 * bb_ * L * E * 4                        # double-buffered in+out blocks
        wts = (E * 3 * E + 3 * E * E) * itemsize + E * 4
        return attn + conv + stats + io + wts

    budget = 40 * 1024 * 1024
    while bb > 1 and vmem_bytes(bb) > budget:
        bb -= 1
    if bb >= B and B > 1:                         # keep a >=2-step parallel grid
        bb = max(1, B // 2)
    while B % bb:                                 # pallas grid needs B % bb == 0
        bb -= 1
    return bb


def self_attention_pallas(x, wq, wk, wv, w_conv, b_conv, heads, *,
                          batch_block=None, mxu_dtype=jnp.bfloat16,
                          approx_recip=None, fuse_conv_taps=True):
    B, L, E = x.shape
    head_dim = E // heads
    assert head_dim * heads == E, "embed_size must be divisible by heads"
    f32 = jnp.float32
    itemsize = np.dtype(mxu_dtype).itemsize
    if approx_recip is None:
        # EUP vrcp is nearly free, but its ~1e-4 relative error sits right at
        # the f32 correctness tolerance; enable it only on the bf16 perf path.
        approx_recip = np.dtype(mxu_dtype) != np.dtype(np.float32)
    if batch_block is None:
        batch_block = _pick_batch_block(B, L, E, heads, itemsize)
    assert B % batch_block == 0, "batch must be divisible by batch_block"

    # --- Weight repacking.  Runs under the caller's jit, so it is traced and
    # compiled once per shape rather than re-executed eagerly per call. ---
    scale = 1.0 / jnp.sqrt(jnp.asarray(head_dim, f32))
    w_qkv = jnp.concatenate([(wq * scale).T, wk.T, wv.T], axis=1).astype(mxu_dtype)
    # Conv taps fused into a single (3E, E) matmul weight, rows ordered k=0,1,2
    # to match the [M[t-1] | M[t] | M[t+1]] lane stacking in the kernel.
    wc_fused = jnp.concatenate([w_conv[:, :, k].T for k in range(3)],
                               axis=0).astype(mxu_dtype)
    bc = b_conv.reshape(1, E).astype(f32)

    # Advisory cost estimate so XLA schedules surrounding ops around the call.
    Gt = B * heads
    flops = 2 * (B * L * E * 3 * E           # fused QKV projection
                 + 2 * Gt * L * L * E        # scores + P@V (full-E masked contraction)
                 + B * L * 3 * E * E)        # conv-as-matmul
    transcendentals = Gt * L * L + Gt * L
    bytes_accessed = (B * L * E * (itemsize + 4)
                      + (E * 3 * E + 3 * E * E) * itemsize + E * 4)

    kernel = partial(self_attention_kernel, heads=heads, mxu_dtype=mxu_dtype,
                     approx_recip=approx_recip, fuse_conv_taps=fuse_conv_taps)
    return pl.pallas_call(
        kernel,
        out_shape=jax.ShapeDtypeStruct((B, L, E), jnp.float32),
        grid_spec=pltpu.PrefetchScalarGridSpec(
            num_scalar_prefetch=0,
            grid=(B // batch_block,),
            in_specs=[
                pl.BlockSpec((batch_block, L, E), lambda b: (b, 0, 0)),  # x block
                pl.BlockSpec((E, 3 * E), lambda b: (0, 0)),              # fused Wqkv^T
                pl.BlockSpec((3 * E, E), lambda b: (0, 0)),              # fused conv taps
                pl.BlockSpec((1, E), lambda b: (0, 0)),                  # conv bias
            ],
            out_specs=pl.BlockSpec((batch_block, L, E), lambda b: (b, 0, 0)),
        ),
        compiler_params=pltpu.CompilerParams(
            dimension_semantics=("parallel",),
            # Explicit scoped-VMEM cap: above the 32 MiB default, below v7x's
            # 64 MiB physical (and well below v5e/v6e's 128 MiB).
            vmem_limit_bytes=48 * 1024 * 1024),
        cost_estimate=pl.CostEstimate(flops=flops,
                                      transcendentals=transcendentals,
                                      bytes_accessed=bytes_accessed),
    )(x.astype(mxu_dtype), w_qkv, wc_fused, bc)


def self_attention_ref(x, wq, wk, wv, w_conv, b_conv, heads):
    """Pure-JAX reference mirroring the PyTorch forward (eval mode)."""
    B, L, E = x.shape
    D = E // heads
    q = (x @ wq.T).reshape(B, L, heads, D).transpose(0, 2, 1, 3)
    k = (x @ wk.T).reshape(B, L, heads, D).transpose(0, 2, 1, 3)
    v = (x @ wv.T).reshape(B, L, heads, D).transpose(0, 2, 1, 3)
    scores = jnp.einsum("bhqd,bhkd->bhqk", q, k) / jnp.sqrt(jnp.float32(D))
    attn = jax.nn.softmax(scores, axis=-1)
    m = jnp.einsum("bhqk,bhkd->bhqd", attn, v).transpose(0, 2, 1, 3).reshape(B, L, E)
    m_ncl = jnp.transpose(m, (0, 2, 1))                     # (B, E, L)
    out_ncl = jax.lax.conv_general_dilated(
        m_ncl, w_conv, window_strides=(1,), padding=((1, 1),),
        dimension_numbers=("NCH", "OIH", "NCH"))
    out_ncl = out_ncl + b_conv[None, :, None]
    return jnp.transpose(out_ncl, (0, 2, 1))                # (B, L, E)


if __name__ == "__main__":
    # Small but lane-dense shapes: E a multiple of 128 keeps every matmul dim
    # and the output store unmasked; B=4 gives the auto-tiler a 2-step
    # parallel grid (batch_block=2) so v7x's second TensorCore is not idle.
    B, L, E, H = 4, 8, 128, 4

    key = jax.random.PRNGKey(0)
    kx, kq, kk, kv, kcw, kcb = jax.random.split(key, 6)
    x = jax.random.normal(kx, (B, L, E), dtype=jnp.float32)
    wq = jax.random.normal(kq, (E, E), dtype=jnp.float32) * (1.0 / jnp.sqrt(E))
    wk = jax.random.normal(kk, (E, E), dtype=jnp.float32) * (1.0 / jnp.sqrt(E))
    wv = jax.random.normal(kv, (E, E), dtype=jnp.float32) * (1.0 / jnp.sqrt(E))
    w_conv = jax.random.normal(kcw, (E, E, 3), dtype=jnp.float32) * (1.0 / jnp.sqrt(3 * E))
    b_conv = jax.random.normal(kcb, (E,), dtype=jnp.float32) * 0.01

    # jit the wrapper so weight repacking is compiled once per shape.
    fwd_bf16 = jax.jit(partial(self_attention_pallas, heads=H))            # perf path
    fwd_f32 = jax.jit(partial(self_attention_pallas, heads=H,
                              mxu_dtype=jnp.float32))                      # check path
    fwd_f32_split = jax.jit(partial(self_attention_pallas, heads=H,
                                    mxu_dtype=jnp.float32,
                                    fuse_conv_taps=False))                 # v5e conv variant

    out_bf16 = jax.block_until_ready(fwd_bf16(x, wq, wk, wv, w_conv, b_conv))
    out_f32 = jax.block_until_ready(fwd_f32(x, wq, wk, wv, w_conv, b_conv))
    out_f32_split = jax.block_until_ready(fwd_f32_split(x, wq, wk, wv, w_conv, b_conv))

    ref = self_attention_ref(x, wq, wk, wv, w_conv, b_conv, heads=H)
    assert out_bf16.shape == (B, L, E)
    assert jnp.allclose(out_f32, ref, atol=1e-4, rtol=1e-4), "f32 path mismatch"
    assert jnp.allclose(out_f32_split, ref, atol=1e-4, rtol=1e-4), "split-conv mismatch"
    assert jnp.allclose(out_bf16, ref, atol=5e-2, rtol=5e-2), "bf16 path mismatch"

    print("KERNEL_OK")
</pallas_src>

<mosaic_0001>
module attributes {stable_mosaic.version = 11 : i64} {
  func.func @self_attention_kernel(%arg0: i32, %arg1: memref<2x8x128xbf16, #tpu.memory_space<vmem>>, %arg2: memref<128x384xbf16, #tpu.memory_space<vmem>>, %arg3: memref<384x128xbf16, #tpu.memory_space<vmem>>, %arg4: memref<1x128xf32, #tpu.memory_space<vmem>>, %arg5: memref<2x8x128xf32, #tpu.memory_space<vmem>>) attributes {dimension_semantics = [#tpu.dimension_semantics<parallel>], iteration_bounds = array<i64: 2>, scalar_prefetch = 0 : i64, scratch_operands = 0 : i64, tpu.core_type = #tpu.core_type<tc>, window_params = [{transform_indices = @transform_0, window_bounds = array<i64: 2, 8, 128>}, {pipeline_mode = #tpu.pipeline_mode<synchronous>, transform_indices = @transform_1, window_bounds = array<i64: 128, 384>}, {pipeline_mode = #tpu.pipeline_mode<synchronous>, transform_indices = @transform_2, window_bounds = array<i64: 384, 128>}, {pipeline_mode = #tpu.pipeline_mode<synchronous>, transform_indices = @transform_3, window_bounds = array<i64: 1, 128>}, {transform_indices = @transform_4, window_bounds = array<i64: 2, 8, 128>}]} {
    %c0 = arith.constant 0 : index
    %c0_0 = arith.constant 0 : index
    %c0_1 = arith.constant 0 : index
    %0 = vector.load %arg1[%c0, %c0_0, %c0_1] : memref<2x8x128xbf16, #tpu.memory_space<vmem>>, vector<2x8x128xbf16>
    %1 = vector.shape_cast %0 : vector<2x8x128xbf16> to vector<16x128xbf16>
    %c0_2 = arith.constant 0 : index
    %c0_3 = arith.constant 0 : index
    %2 = vector.load %arg2[%c0_2, %c0_3] : memref<128x384xbf16, #tpu.memory_space<vmem>>, vector<128x384xbf16>
    %cst = arith.constant dense<0.000000e+00> : vector<16x384xf32>
    %3 = tpu.matmul %1, %2, %cst {dimension_numbers = #tpu.dot_dimension_numbers<[1], [0], [0], [1], [0, 0, 1, 1], [], []>} : vector<16x128xbf16>, vector<128x384xbf16>, vector<16x384xf32> -> vector<16x384xf32>
    %4 = tpu.iota {dimensions = array<i32: 1>} : vector<2x4x1x128xi32>
    %5 = tpu.iota {dimensions = array<i32: 3>} : vector<2x4x1x128xi32>
    %c32_i32 = arith.constant 32 : i32
    %6 = vector.broadcast %c32_i32 : i32 to vector<2x4x1x128xi32>
    %7 = arith.muli %4, %6 : vector<2x4x1x128xi32>
    %8 = arith.cmpi sge, %5, %7 : vector<2x4x1x128xi32>
    %c32_i32_4 = arith.constant 32 : i32
    %9 = vector.broadcast %c32_i32_4 : i32 to vector<2x4x1x128xi32>
    %10 = arith.addi %7, %9 : vector<2x4x1x128xi32>
    %11 = arith.cmpi slt, %5, %10 : vector<2x4x1x128xi32>
    %12 = arith.andi %8, %11 : vector<2x4x1x128xi1>
    %13 = arith.extui %12 : vector<2x4x1x128xi1> to vector<2x4x1x128xi32>
    %14 = arith.sitofp %13 : vector<2x4x1x128xi32> to vector<2x4x1x128xf32>
    %15 = arith.truncf %14 : vector<2x4x1x128xf32> to vector<2x4x1x128xbf16>
    %16 = vector.shape_cast %15 : vector<2x4x1x128xbf16> to vector<8x1x128xbf16>
    %17 = vector.extract_strided_slice %3 {offsets = [0, 0], sizes = [16, 128], strides = [1, 1]} : vector<16x384xf32> to vector<16x128xf32>
    %18 = arith.truncf %17 : vector<16x128xf32> to vector<16x128xbf16>
    %19 = vector.shape_cast %18 : vector<16x128xbf16> to vector<2x1x8x128xbf16>
    %20 = vector.shape_cast %19 : vector<2x1x8x128xbf16> to vector<2x1x8x128xbf16>
    %21 = vector.broadcast %20 : vector<2x1x8x128xbf16> to vector<2x4x8x128xbf16>
    %22 = vector.shape_cast %21 : vector<2x4x8x128xbf16> to vector<8x8x128xbf16>
    %23 = vector.broadcast %16 : vector<8x1x128xbf16> to vector<8x8x128xbf16>
    %24 = arith.mulf %22, %23 : vector<8x8x128xbf16>
    %25 = vector.extract_strided_slice %3 {offsets = [0, 128], sizes = [16, 128], strides = [1, 1]} : vector<16x384xf32> to vector<16x128xf32>
    %26 = arith.truncf %25 : vector<16x128xf32> to vector<16x128xbf16>
    %27 = vector.shape_cast %26 : vector<16x128xbf16> to vector<2x1x8x128xbf16>
    %28 = vector.shape_cast %27 : vector<2x1x8x128xbf16> to vector<2x1x8x128xbf16>
    %29 = vector.broadcast %28 : vector<2x1x8x128xbf16> to vector<2x4x8x128xbf16>
    %30 = vector.shape_cast %29 : vector<2x4x8x128xbf16> to vector<8x8x128xbf16>
    %31 = vector.extract_strided_slice %3 {offsets = [0, 256], sizes = [16, 128], strides = [1, 1]} : vector<16x384xf32> to vector<16x128xf32>
    %32 = arith.truncf %31 : vector<16x128xf32> to vector<16x128xbf16>
    %33 = vector.shape_cast %32 : vector<16x128xbf16> to vector<2x1x8x128xbf16>
    %34 = vector.shape_cast %33 : vector<2x1x8x128xbf16> to vector<2x1x8x128xbf16>
    %35 = vector.broadcast %34 : vector<2x1x8x128xbf16> to vector<2x4x8x128xbf16>
    %36 = vector.shape_cast %35 : vector<2x4x8x128xbf16> to vector<8x8x128xbf16>
    %37 = vector.broadcast %16 : vector<8x1x128xbf16> to vector<8x8x128xbf16>
    %38 = arith.mulf %36, %37 : vector<8x8x128xbf16>
    "tpu.trace_start"() <{level = 10 : i32, message = "gqe,gke->gqk"}> : () -> ()
    %cst_5 = arith.constant dense<0.000000e+00> : vector<8x8x8xf32>
    %39 = tpu.matmul %24, %30, %cst_5 {dimension_numbers = #tpu.dot_dimension_numbers<[2], [2], [1], [1], [0, 0, 0, 1, 1, 1], [0], [0]>} : vector<8x8x128xbf16>, vector<8x8x128xbf16>, vector<8x8x8xf32> -> vector<8x8x8xf32>
    "tpu.trace_stop"() : () -> ()
    %cst_6 = arith.constant dense<0xFF800000> : vector<8x8xf32>
    %40 = vector.multi_reduction <maximumf>, %39, %cst_6 [2] : vector<8x8x8xf32> to vector<8x8xf32>
    %41 = vector.shape_cast %40 : vector<8x8xf32> to vector<8x8x1xf32>
    %42 = vector.broadcast %41 : vector<8x8x1xf32> to vector<8x8x8xf32>
    %43 = arith.subf %39, %42 : vector<8x8x8xf32>
    %44 = math.exp %43 : vector<8x8x8xf32>
    %cst_7 = arith.constant dense<0.000000e+00> : vector<8x8xf32>
    %45 = vector.multi_reduction <add>, %44, %cst_7 [2] : vector<8x8x8xf32> to vector<8x8xf32>
    %46 = vector.shape_cast %45 : vector<8x8xf32> to vector<8x8x1xf32>
    %47 = arith.truncf %44 : vector<8x8x8xf32> to vector<8x8x8xbf16>
    "tpu.trace_start"() <{level = 10 : i32, message = "gqk,gke->gqe"}> : () -> ()
    %cst_8 = arith.constant dense<0.000000e+00> : vector<8x8x128xf32>
    %48 = tpu.matmul %47, %38, %cst_8 {dimension_numbers = #tpu.dot_dimension_numbers<[2], [1], [1], [2], [0, 0, 0, 1, 1, 2], [0], [0]>} : vector<8x8x8xbf16>, vector<8x8x128xbf16>, vector<8x8x128xf32> -> vector<8x8x128xf32>
    "tpu.trace_stop"() : () -> ()
    %49 = tpu.reciprocal %46 {approx = true} : vector<8x8x1xf32> -> vector<8x8x1xf32>
    %50 = vector.broadcast %49 : vector<8x8x1xf32> to vector<8x8x128xf32>
    %51 = arith.mulf %48, %50 : vector<8x8x128xf32>
    %52 = vector.shape_cast %51 : vector<8x8x128xf32> to vector<2x4x8x128xf32>
    %53 = vector.extract_strided_slice %52 {offsets = [0, 0, 0, 0], sizes = [2, 1, 8, 128], strides = [1, 1, 1, 1]} : vector<2x4x8x128xf32> to vector<2x1x8x128xf32>
    %54 = vector.shape_cast %53 : vector<2x1x8x128xf32> to vector<2x8x128xf32>
    %55 = vector.extract_strided_slice %52 {offsets = [0, 1, 0, 0], sizes = [2, 1, 8, 128], strides = [1, 1, 1, 1]} : vector<2x4x8x128xf32> to vector<2x1x8x128xf32>
    %56 = vector.shape_cast %55 : vector<2x1x8x128xf32> to vector<2x8x128xf32>
    %57 = arith.addf %54, %56 : vector<2x8x128xf32>
    %58 = vector.extract_strided_slice %52 {offsets = [0, 2, 0, 0], sizes = [2, 1, 8, 128], strides = [1, 1, 1, 1]} : vector<2x4x8x128xf32> to vector<2x1x8x128xf32>
    %59 = vector.shape_cast %58 : vector<2x1x8x128xf32> to vector<2x8x128xf32>
    %60 = arith.addf %57, %59 : vector<2x8x128xf32>
    %61 = vector.extract_strided_slice %52 {offsets = [0, 3, 0, 0], sizes = [2, 1, 8, 128], strides = [1, 1, 1, 1]} : vector<2x4x8x128xf32> to vector<2x1x8x128xf32>
    %62 = vector.shape_cast %61 : vector<2x1x8x128xf32> to vector<2x8x128xf32>
    %63 = arith.addf %60, %62 : vector<2x8x128xf32>
    %64 = vector.shape_cast %63 : vector<2x8x128xf32> to vector<16x128xf32>
    %65 = tpu.iota {dimensions = array<i32: 1>} : vector<2x8x128xi32>
    %66 = vector.shape_cast %65 : vector<2x8x128xi32> to vector<16x128xi32>
    %c1_i32 = arith.constant 1 : i32
    %67 = vector.broadcast %c1_i32 : i32 to vector<16x128xi32>
    %68 = arith.cmpi sge, %66, %67 : vector<16x128xi32>
    %69 = vector.extract_strided_slice %64 {offsets = [15, 0], sizes = [1, 128], strides = [1, 1]} : vector<16x128xf32> to vector<1x128xf32>
    %70 = vector.extract_strided_slice %64 {offsets = [0, 0], sizes = [15, 128], strides = [1, 1]} : vector<16x128xf32> to vector<15x128xf32>
    %71 = tpu.concatenate %69, %70 in 0 : vector<1x128xf32>, vector<15x128xf32> -> vector<16x128xf32>
    %cst_9 = arith.constant 0.000000e+00 : f32
    %72 = vector.broadcast %cst_9 : f32 to vector<16x128xf32>
    %73 = arith.select %68, %71, %72 : vector<16x128xi1>, vector<16x128xf32>
    %c6_i32 = arith.constant 6 : i32
    %74 = vector.broadcast %c6_i32 : i32 to vector<16x128xi32>
    %75 = arith.cmpi sle, %66, %74 : vector<16x128xi32>
    %76 = vector.extract_strided_slice %64 {offsets = [1, 0], sizes = [15, 128], strides = [1, 1]} : vector<16x128xf32> to vector<15x128xf32>
    %77 = vector.extract_strided_slice %64 {offsets = [0, 0], sizes = [1, 128], strides = [1, 1]} : vector<16x128xf32> to vector<1x128xf32>
    %78 = tpu.concatenate %76, %77 in 0 : vector<15x128xf32>, vector<1x128xf32> -> vector<16x128xf32>
    %cst_10 = arith.constant 0.000000e+00 : f32
    %79 = vector.broadcast %cst_10 : f32 to vector<16x128xf32>
    %80 = arith.select %75, %78, %79 : vector<16x128xi1>, vector<16x128xf32>
    %81 = tpu.concatenate %73, %64, %80 in 1 : vector<16x128xf32>, vector<16x128xf32>, vector<16x128xf32> -> vector<16x384xf32>
    %82 = arith.truncf %81 : vector<16x384xf32> to vector<16x384xbf16>
    %c0_11 = arith.constant 0 : index
    %c0_12 = arith.constant 0 : index
    %83 = vector.load %arg3[%c0_11, %c0_12] : memref<384x128xbf16, #tpu.memory_space<vmem>>, vector<384x128xbf16>
    %cst_13 = arith.constant dense<0.000000e+00> : vector<16x128xf32>
    %84 = tpu.matmul %82, %83, %cst_13 {dimension_numbers = #tpu.dot_dimension_numbers<[1], [0], [0], [1], [0, 0, 1, 1], [], []>} : vector<16x384xbf16>, vector<384x128xbf16>, vector<16x128xf32> -> vector<16x128xf32>
    %c0_14 = arith.constant 0 : index
    %c0_15 = arith.constant 0 : index
    %85 = vector.load %arg4[%c0_14, %c0_15] : memref<1x128xf32, #tpu.memory_space<vmem>>, vector<1x128xf32>
    %86 = vector.broadcast %85 : vector<1x128xf32> to vector<16x128xf32>
    %87 = arith.addf %84, %86 : vector<16x128xf32>
    %88 = vector.shape_cast %87 : vector<16x128xf32> to vector<2x8x128xf32>
    %c0_16 = arith.constant 0 : index
    %c0_17 = arith.constant 0 : index
    %c0_18 = arith.constant 0 : index
    %89 = vector.load %arg5[%c0_16, %c0_17, %c0_18] : memref<2x8x128xf32, #tpu.memory_space<vmem>>, vector<2x8x128xf32>
    tpu.vector_store %arg5[%c0_16, %c0_17, %c0_18], %88 {strides = array<i32>} : memref<2x8x128xf32, #tpu.memory_space<vmem>>, vector<2x8x128xf32>,
    return
  }
  func.func @transform_0(%arg0: i32) -> (i32, i32, i32) {
    %c0_i32 = arith.constant 0 : i32
    %c0_i32_0 = arith.constant 0 : i32
    %c0_i32_1 = arith.constant 0 : i32
    return %arg0, %c0_i32, %c0_i32_0 : i32, i32, i32
  }
  func.func @transform_1(%arg0: i32) -> (i32, i32) {
    %c0_i32 = arith.constant 0 : i32
    %c0_i32_0 = arith.constant 0 : i32
    %c0_i32_1 = arith.constant 0 : i32
    return %c0_i32, %c0_i32_0 : i32, i32
  }
  func.func @transform_2(%arg0: i32) -> (i32, i32) {
    %c0_i32 = arith.constant 0 : i32
    %c0_i32_0 = arith.constant 0 : i32
    %c0_i32_1 = arith.constant 0 : i32
    return %c0_i32, %c0_i32_0 : i32, i32
  }
  func.func @transform_3(%arg0: i32) -> (i32, i32) {
    %c0_i32 = arith.constant 0 : i32
    %c0_i32_0 = arith.constant 0 : i32
    %c0_i32_1 = arith.constant 0 : i32
    return %c0_i32, %c0_i32_0 : i32, i32
  }
  func.func @transform_4(%arg0: i32) -> (i32, i32, i32) {
    %c0_i32 = arith.constant 0 : i32
    %c0_i32_0 = arith.constant 0 : i32
    %c0_i32_1 = arith.constant 0 : i32
    return %arg0, %c0_i32, %c0_i32_0 : i32, i32, i32
  }
}

</mosaic_0001>

<bundles_post_ra>
// kernel: self_attention_pallas.1
= control target key start
LH: loop header
LB: loop body
LE: loop exit
PB: predicated region body
PF: predicated region fallthrough
CT: control target
= control target key end

     0   :  { %9 = vsyncpa [#allocation3], 0  ;;  %s2612_s0 = inlined_call_operand.vmem [shape: bf16[4,8,128], index: 0, kind: input, shape index: {}]   ;;  %s2613_s1 = inlined_call_operand.vmem [shape: bf16[128,384], index: 1, kind: input, shape index: {}]   ;;  %s2614_s2 = inlined_call_operand.vmem [shape: bf16[384,128], index: 2, kind: input, shape index: {}]   ;;  %s2615_s3 = inlined_call_operand.vmem [shape: f32[1,128], index: 3, kind: input, shape index: {}]   ;;  %s2616_s4 = inlined_call_operand.hbm [shape: f32[4,8,128], index: 4, kind: output, shape index: {}]  }
   0x1   :  { %11 = vsyncpa [#allocation3 + $0x1], 0  ;;  %s2225_s15 = smov 0   ;;  %s2227_s16 = smov 0  }
   0x2   :  { %s2229_s17 = smov 0   ;;  %s2231_s18 = smov 0  }
   0x3 LB: > { %s2246_s19 = sadd.s32 4294967295, %s2192_s18   ;;  %s1698_s20 = sadd.s32 4294967294, %s2192_s18   ;;  %s2192_s18 = sphi %s2231_s18, %s2622_s18   ;;  %s2188_s17 = sphi %s2229_s17, %s2621_s17   ;;  %s2184_s16 = sphi %s2227_s16, %s2620_s16   ;;  %s2180_s15 = sphi %s2225_s15, %s2619_s15  }
   0x4   : > { %s2250_s21 = sadd.s32 1, %s2192_s18   ;;  %s113_s22 = sadd.s32 1, %s2188_s17 }
   0x5   : > { %s110_s23 = ssub.s32 %s2192_s18, %s2250_s21  ;;  %p123_p0 = scmp.ne.s32.totalorder %s2188_s17, %s2184_s16 }
   0x6   : > { %p111_p1 = scmp.eq.s32.totalorder %s110_s23, 0  ;;  %p124_p2 = scmp.eq.s32.totalorder %s2246_s19, 1 }
   0x7   : > { %p129_p3 = scmp.ne.s32.totalorder %s2184_s16, %s2180_s15  ;;  %p130_p4 = scmp.eq.s32.totalorder %s1698_s20, 1 }
   0x8   : > { %s2261_s24 = scalar_select %p111_p1, %s2188_s17, %s113_s22  }
   0x9   : > { %p2263_p5 = por %p124_p2, %p123_p0  ;;  %p2267_p6 = por %p130_p4, %p129_p3 }
   0xa   : > { %p1701_p7 = scmp.ge.s32.totalorder %s2192_s18, 1  ;;  %p166_p8 = scmp.lt.s32.totalorder %s2192_s18, 3 }
   0xc   : > { %p167_p9 = pnand %p1701_p7, %p166_p8 }
   0xd   : > { %s1703_s29 = sshll.u32 (!%p167_p9), %s2246_s19, 1  ;;  %s189_s27 = sand.u32 (!%p167_p9), 1, %s2184_s16  }
   0xe   : > { %170 = sbr.rel (%p167_p9) target bundleno = 1057 (0x421), region = 36  ;;  %p193_p10 = scmp.lt.s32.totalorder (!%p167_p9), %s1703_s29, 3 }
   0xf   : > { %s1702_s5 = sshll.u32 (!%p167_p9), %s189_s27, 4  ;;  %s1790_s7 = sshll.u32 (!%p167_p9), %s2246_s19, 8 }
  0x10   : > { %s2570_s10 = scalar_lea.hbm (!%p167_p9), %s2616_s4, %s1790_s7  ;;  %s2572_s11 = scalar_lea.sflag (!%p167_p9), [#allocation3], %s189_s27 }
  0x11   : > { %s2197_s19 = smov (!%p167_p9), [#allocation2]  }
  0x12   : > { %s2136_s13 = sshll.u32 (!%p167_p9), %s2197_s19, 4  ;;  %s2137_s13 = int_to_ptr.vmem [resolvable:$false] %s2136_s13 }
  0x13   : > { %v2043_v0 = vld [vmem:[%s2613_s1 + $0xac] ss:$12 sps:$4 sm:$0xff]   ;;  %v2045_v1 = vld [vmem:[%s2613_s1 + $0xa8] ss:$12 sps:$4 sm:$0xff]   ;;  %v2194_v2 = vmov 0   ;;  %v2195_v4 = vmov 0.0   ;;  %v452_v27 = vlaneseq }
  0x14   : > { %400 = vmatprep.mubr.bf16.mxu0 %v2194_v2  ;;  %368 = vmatprep.subr.bf16.mxu0 %v2043_v0  ;;  %v2046_v3 = vld [vmem:[%s2613_s1 + $0x94] ss:$12 sps:$4 sm:$0xff]   ;;  %v2048_v5 = vld [vmem:[%s2613_s1 + $0x90] ss:$12 sps:$4 sm:$0xff]   ;;  %s2624_s29 = smov (!%p193_p10, %s1703_s29), 3  ;;  %vm2196_vm0 = vmmov 0  }
  0x15   : > { %1863 = vmatprep.subr.bf16.mxu1 %v2195_v4  ;;  %369 = vmatpush1.bf16.msra.mxu0 %v2045_v1  ;;  %v2049_v6 = vld [vmem:[%s2613_s1 + $0x7c] ss:$12 sps:$4 sm:$0xff]   ;;  %s1704_s12 = sshll.u32 %s2624_s29, 2  ;;  %v2051_v7 = vld [vmem:[%s2613_s1 + $0x78] ss:$12 sps:$4 sm:$0xff]   ;;  %v453_v28 = vand.u32 127, %v452_v27 }
  0x16   : > { %370 = vmatprep.subr.bf16.mxu0 %v2046_v3  ;;  %v2052_v8 = vld [vmem:[%s2613_s1 + $0x64] ss:$12 sps:$4 sm:$0xff]   ;;  %s2299_s28 = scalar_lea.vmem %s2612_s0, %s1704_s12  ;;  %v2054_v9 = vld [vmem:[%s2613_s1 + $0x60] ss:$12 sps:$4 sm:$0xff]   ;;  %v2057_v13 = vld [vmem:[%s2613_s1 + $0x48] ss:$12 sps:$4 sm:$0xff]   ;;  %1879 = vmatprep.mubr.msk.bf16.mxu1 %vm2196_vm0, %v2195_v4 }
  0x17   : > { %v2055_v10 = vld [vmem:[%s2613_s1 + $0x4c] ss:$12 sps:$4 sm:$0xff]   ;;  %v2068_v11 = vld [vmem:[%s2613_s1 + $0xb0] ss:$12 sps:$4 sm:$0xff]   ;;  %v2058_v14 = vld [vmem:[%s2613_s1 + $0x34] ss:$12 sps:$4 sm:$0xff]  }
  0x18   : > { %1864 = vmatpush3.bf16.msra.mxu1 %v2068_v11  ;;  %v2069_v12 = vld [vmem:[%s2613_s1 + $0x98] ss:$12 sps:$4 sm:$0xff]   ;;  %v2060_v15 = vld [vmem:[%s2613_s1 + $0x30] ss:$12 sps:$4 sm:$0xff]   ;;  %v2070_v17 = vld [vmem:[%s2613_s1 + $0x80] ss:$12 sps:$4 sm:$0xff]  }
  0x19   : > { %371 = vmatpush1.bf16.msra.mxu0 %v2048_v5  ;;  %1865 = vmatprep.subr.bf16.mxu1 %v2195_v4  ;;  %v2061_v16 = vld [vmem:[%s2613_s1 + $0x1c] ss:$12 sps:$4 sm:$0xff]   ;;  %v2063_v19 = vld [vmem:[%s2613_s1 + $0x18] ss:$12 sps:$4 sm:$0xff]   ;;  %v2066_v22 = vld [vmem:[%s2613_s1] ss:$12 sps:$4 sm:$0xff]  }
  0x1a   : > { %372 = vmatprep.subr.bf16.mxu0 %v2049_v6  ;;  %v2071_v18 = vld [vmem:[%s2613_s1 + $0x68] ss:$12 sps:$4 sm:$0xff]   ;;  %v2064_v20 = vld [vmem:[%s2613_s1 + $0x4] ss:$12 sps:$4 sm:$0xff]   ;;  %v2074_v25 = vld [vmem:[%s2613_s1 + $0x20] ss:$12 sps:$4 sm:$0xff]  }
  0x1b   : > { %v2072_v21 = vld [vmem:[%s2613_s1 + $0x50] ss:$12 sps:$4 sm:$0xff]   ;;  %v2067_v23 = vld [vmem:[%s2299_s28] sm:$0xff]   ;;  %v2075_v26 = vld [vmem:[%s2613_s1 + $0x8] ss:$12 sps:$4 sm:$0xff]   ;;  %vm455_vm1 = vcmp.ge.s32.totalorder %v453_v28, 32 }
  0x1c   : > { %1866 = vmatpush3.bf16.msra.mxu1 %v2069_v12  ;;  %v2073_v24 = vld [vmem:[%s2613_s1 + $0x38] ss:$12 sps:$4 sm:$0xff]   ;;  %vm459_vm2 = vcmp.lt.s32.totalorder %v453_v28, 64  ;;  %vm458_vm3 = vcmp.lt.s32.totalorder %v453_v28, 32  ;;  %vm456_vm5 = vcmp.ge.s32.totalorder %v453_v28, 64  ;;  %vm460_vm6 = vcmp.lt.s32.totalorder %v453_v28, 96 }
  0x1d   : > { %373 = vmatpush1.bf16.msra.mxu0 %v2051_v7  ;;  %1867 = vmatprep.subr.bf16.mxu1 %v2195_v4  ;;  %vm463_vm4 = vmand %vm455_vm1, %vm459_vm2  ;;  %v1730_v32 = vsel %vm458_vm3, 1.0, %v2195_v4  ;;  %vm457_vm8 = vcmp.ge.s32.totalorder %v453_v28, 96  ;;  %vm922_vm9 = vcmask 1043456   ;;  %vm838_vm10 = vcmask 64512   ;;  %s191_s29 = scalar_lea.vmem [#allocation2], %s1702_s5  ;;  %s2138_s14 = scalar_lea.vmem %s2137_s13, 512 }
  0x1e   : > { %374 = vmatprep.subr.bf16.mxu0 %v2052_v8  ;;  %v1731_v33 = vsel %vm463_vm4, 1.0, %v2195_v4  ;;  %v2371_v35 = vpack.c.bf16 %v1730_v32, %v1730_v32  ;;  %vm464_vm7 = vmand %vm456_vm5, %vm460_vm6  ;;  %v1733_v40 = vsel %vm457_vm8, 1.0, %v2195_v4  ;;  %vm1317_vm12 = vcmask 1040384   ;;  %s1636_s6 = sshll.u32 %s191_s29, 4  ;;  %s2565_s6 = int_to_ptr.vmem [resolvable:$true] %s1636_s6 }
  0x1f   : > { %v2373_v36 = vpack.c.bf16 %v1731_v33, %v1731_v33  ;;  %v1732_v39 = vsel %vm464_vm7, 1.0, %v2195_v4  ;;  %v477_v43 = vpack.c.bf16 %v1733_v40, %v1733_v40  ;;  %vm1326_vm13 = vcmask 1046528   ;;  %s2132_s12 = scalar_lea.vmem %s2565_s6, 256  ;;  %p2139_p0 = scmp.lt.s32.totalorder %s2565_s6, %s2137_s13 }
  0x20   : > { %1868 = vmatpush3.bf16.msra.mxu1 %v2070_v17  ;;  %v476_v42 = vpack.c.bf16 %v1732_v39, %v1732_v39  ;;  %p2133_p11 = scmp.ne.s32.totalorder %s2565_s6, %s2132_s12  ;;  %p2140_p1 = scmp.lt.s32.totalorder %s2138_s14, %s2132_s12 }
  0x21   : > { %375 = vmatpush1.bf16.msra.mxu0 %v2054_v9  ;;  %1869 = vmatprep.subr.bf16.mxu1 %v2195_v4 }
  0x22   : > { %376 = vmatprep.subr.bf16.mxu0 %v2055_v10  ;;  %p2134_p12 = pnand %p2133_p11, %p2263_p5  ;;  %p2141_p2 = por %p2140_p1, %p2139_p0 }
  0x24   : > { %1870 = vmatpush3.bf16.msra.mxu1 %v2071_v18  ;;  %p2135_p13 = pneg %p2134_p12 }
  0x25   : > { %377 = vmatpush1.bf16.msra.mxu0 %v2057_v13  ;;  %1871 = vmatprep.subr.bf16.mxu1 %v2195_v4 }
  0x26   : > { %378 = vmatprep.subr.bf16.mxu0 %v2058_v14  ;;  %p2142_p3 = pnand %p2141_p2, %p2135_p13 }
  0x28   : > { %1872 = vmatpush3.bf16.msra.mxu1 %v2072_v21 }
  0x29   : > { %379 = vmatpush1.bf16.msra.mxu0 %v2060_v15  ;;  %1873 = vmatprep.subr.bf16.mxu1 %v2195_v4 }
  0x2a   : > { %380 = vmatprep.subr.bf16.mxu0 %v2061_v16 }
  0x2c   : > { %1874 = vmatpush3.bf16.msra.mxu1 %v2073_v24 }
  0x2d   : > { %381 = vmatpush1.bf16.msra.mxu0 %v2063_v19  ;;  %1875 = vmatprep.subr.bf16.mxu1 %v2195_v4 }
  0x2e   : > { %382 = vmatprep.subr.bf16.mxu0 %v2064_v20 }
  0x30   : > { %1876 = vmatpush3.bf16.msra.mxu1 %v2074_v25 }
  0x31   : > { %383 = vmatpush1.bf16.msra.mxu0 %v2066_v22  ;;  %1877 = vmatprep.subr.bf16.mxu1 %v2195_v4 }
  0x32   : > { %1883 = vmatprep.subr.bf16.mxu0 %v2195_v4 }
  0x34   : > { %401 = vmatmul.mubr.bf16.vlgmr.msra.gmra.mxu0 %v2067_v23  ;;  %1878 = vmatpush3.bf16.msra.mxu1 %v2075_v26 }
  0x35   : > { %1889 = vmatprep.subr.bf16.mxu1 %v2195_v4  ;;  %1885 = vmatprep.mubr.msk.bf16.mxu0 %vm2196_vm0, %v2195_v4 }
  0x37   : > { %1880 = vmatmul.mubr.bf16.vlgmr.msra.gmra.mxu1 %v2067_v23 }
  0x38   : > { %1891 = vmatprep.mubr.msk.bf16.mxu1 %vm2196_vm0, %v2195_v4 }
  0xf4   : > { %v402_v29 = vpop.f32.mrf.mxu0 }
  0xf5   : > { %v1784_v34 = vpack.c.bf16 %v402_v29, %v402_v29 }
  0xf6   : > { %v404_v30 = vpop.f32.mrf.mxu0 }
  0xf7   : > { %v1786_v31 = vpack.c.bf16 %v404_v30, %v404_v30  ;;  %v486_v37 = vmul.bf16 %v1784_v34, %v2371_v35  ;;  %v487_v38 = vmul.bf16 %v1784_v34, %v2373_v36  ;;  %v488_v45 = vmul.bf16 %v1784_v34, %v476_v42  ;;  %v445_v53 = vpop.f32.mrf.mxu1 }
  0xf8   : > { %v406_v41 = vpop.f32.mrf.mxu0  ;;  %v489_v46 = vmul.bf16 %v1784_v34, %v477_v43  ;;  %v1788_v56 = vpack.c.bf16 %v445_v53, %v445_v53 }
  0xf9   : > { %1884 = vmatpush3.bf16.xpose.msra.mxu0 %v1786_v31  ;;  %1890 = vmatpush3.bf16.xpose.msra.mxu1 %v1786_v31  ;;  %v1785_v48 = vpack.c.bf16 %v406_v41, %v406_v41  ;;  %v1881_v54 = vpop.f32.mrf.mxu1 }
  0xfa   : > { %1895 = vmatprep.subr.bf16.mxu0 %v2195_v4  ;;  %1901 = vmatprep.subr.bf16.mxu1 %v2195_v4  ;;  %v408_v44 = vpop.f32.mrf.mxu0  ;;  %v510_v59 = vmul.bf16 %v1788_v56, %v2371_v35  ;;  %v511_v60 = vmul.bf16 %v1788_v56, %v2373_v36  ;;  %v512_v61 = vmul.bf16 %v1788_v56, %v476_v42 }
  0xfb   : > { %v1787_v47 = vpack.c.bf16 %v408_v44, %v408_v44  ;;  %v490_v49 = vmul.bf16 %v1785_v48, %v2371_v35  ;;  %v491_v50 = vmul.bf16 %v1785_v48, %v2373_v36  ;;  %v492_v51 = vmul.bf16 %v1785_v48, %v476_v42  ;;  %v448_v55 = vpop.f32.mrf.mxu1 }
  0xfc   : > { %v493_v52 = vmul.bf16 %v1785_v48, %v477_v43  ;;  %v1789_v58 = vpack.c.bf16 %v448_v55, %v448_v55  ;;  %v513_v62 = vmul.bf16 %v1788_v56, %v477_v43  ;;  %v924_v1 = vsel %vm922_vm9, %v510_v59, 0 }
  0xfd   : > { %v1882_v57 = vpop.f32.mrf.mxu1  ;;  %v970_v2 = vsel %vm922_vm9, %v511_v60, 0  ;;  %v2412_v3 = vsel %vm922_vm9, %v512_v61, 0 }
  0xfe   : > { %v514_v63 = vmul.bf16 %v1789_v58, %v2371_v35  ;;  %v515_v0 = vmul.bf16 %v1789_v58, %v2373_v36  ;;  %v2415_v5 = vsel %vm922_vm9, %v513_v62, 0  ;;  %v516_v8 = vmul.bf16 %v1789_v58, %v476_v42 }
  0xff   : > { %v517_v9 = vmul.bf16 %v1789_v58, %v477_v43 }
 0x100   : > { %1886 = vmatmul.mubr.bf16.vlgmr.msra.gmra.mxu0 %v486_v37  ;;  %1892 = vmatmul.mubr.bf16.vlgmr.msra.gmra.mxu1 %v487_v38  ;;  %v2418_v6 = vsel %vm922_vm9, %v514_v63, 0  ;;  %v2421_v7 = vsel %vm922_vm9, %v515_v0, 0  ;;  %v2426_v10 = vsel %vm922_vm9, %v516_v8, 0 }
 0x101   : > { %1896 = vmatpush3.bf16.xpose.msra.mxu0 %v1786_v31  ;;  %1902 = vmatpush3.bf16.xpose.msra.mxu1 %v1786_v31  ;;  %v2429_v11 = vsel %vm922_vm9, %v517_v9, 0 }
 0x102   : > { %1897 = vmatprep.mubr.msk.bf16.mxu0 %vm2196_vm0, %v2195_v4  ;;  %1903 = vmatprep.mubr.msk.bf16.mxu1 %vm2196_vm0, %v2195_v4 }
 0x103   : > { %1907 = vmatprep.subr.bf16.mxu0 %v2195_v4  ;;  %1913 = vmatprep.subr.bf16.mxu1 %v2195_v4 }
 0x108   : > { %1898 = vmatmul.mubr.bf16.vlgmr.msra.gmra.mxu0 %v488_v45  ;;  %1904 = vmatmul.mubr.bf16.vlgmr.msra.gmra.mxu1 %v489_v46 }
 0x109   : > { %1908 = vmatpush3.bf16.xpose.msra.mxu0 %v1787_v47  ;;  %1914 = vmatpush3.bf16.xpose.msra.mxu1 %v1787_v47 }
 0x10a   : > { %1909 = vmatprep.mubr.msk.bf16.mxu0 %vm2196_vm0, %v2195_v4  ;;  %1915 = vmatprep.mubr.msk.bf16.mxu1 %vm2196_vm0, %v2195_v4 }
 0x10b   : > { %1919 = vmatprep.subr.bf16.mxu0 %v2195_v4  ;;  %1925 = vmatprep.subr.bf16.mxu1 %v2195_v4 }
 0x110   : > { %1910 = vmatmul.mubr.bf16.vlgmr.msra.gmra.mxu0 %v490_v49  ;;  %1916 = vmatmul.mubr.bf16.vlgmr.msra.gmra.mxu1 %v491_v50 }
 0x111   : > { %1920 = vmatpush3.bf16.xpose.msra.mxu0 %v1787_v47  ;;  %1926 = vmatpush3.bf16.xpose.msra.mxu1 %v1787_v47 }
 0x112   : > { %1921 = vmatprep.mubr.msk.bf16.mxu0 %vm2196_vm0, %v2195_v4  ;;  %1927 = vmatprep.mubr.msk.bf16.mxu1 %vm2196_vm0, %v2195_v4 }
 0x113   : > { %1931 = vmatprep.subr.bf16.mxu0 %v2195_v4  ;;  %1937 = vmatprep.subr.bf16.mxu1 %v2195_v4 }
 0x118   : > { %1922 = vmatmul.mubr.bf16.vlgmr.msra.gmra.mxu0 %v492_v51  ;;  %1928 = vmatmul.mubr.bf16.vlgmr.msra.gmra.mxu1 %v493_v52 }
 0x119   : > { %1933 = vmatprep.mubr.msk.bf16.mxu0 %vm2196_vm0, %v2195_v4  ;;  %1939 = vmatprep.mubr.msk.bf16.mxu1 %vm2196_vm0, %v2195_v4 }
 0x11a   : > { %1932 = vmatpush3.bf16.msra.mxu0 %v924_v1  ;;  %1938 = vmatpush3.bf16.msra.mxu1 %v970_v2 }
 0x11b   : > { %1943 = vmatprep.subr.bf16.mxu0 %v2195_v4  ;;  %1949 = vmatprep.subr.bf16.mxu1 %v2195_v4 }
 0x1c0   : > { %v552_v12 = vpop.f32.mrf.mxu0  ;;  %v592_v13 = vpop.f32.mrf.mxu1 }
 0x1c1   : > { %v839_v14 = vsel %vm838_vm10, %v552_v12, -inf  ;;  %v842_v19 = vsel %vm838_vm10, %v592_v13, -inf }
 0x1c2   : > { %v1893_v15 = vpop.f32.mrf.mxu1  ;;  %840 = vmax.xlane.f32.xlu0 %v839_v14  ;;  %v1887_v16 = vpop.f32.mrf.mxu0 }
 0x1c4   : > { %v555_v17 = vpop.f32.mrf.mxu0  ;;  %v595_v18 = vpop.f32.mrf.mxu1 }
 0x1c6   : > { %v1894_v20 = vpop.f32.mrf.mxu1  ;;  %843 = vmax.xlane.f32.xlu0 %v842_v19  ;;  %v1888_v21 = vpop.f32.mrf.mxu0 }
 0x1c8   : > { %v632_v22 = vpop.f32.mrf.mxu0  ;;  %v672_v23 = vpop.f32.mrf.mxu1 }
 0x1c9   : > { %v845_v24 = vsel %vm838_vm10, %v632_v22, -inf  ;;  %v848_v30 = vsel %vm838_vm10, %v672_v23, -inf }
 0x1ca   : > { %v1905_v25 = vpop.f32.mrf.mxu1  ;;  %846 = vmax.xlane.f32.xlu1 %v845_v24  ;;  %v1899_v26 = vpop.f32.mrf.mxu0 }
 0x1cc   : > { %v635_v28 = vpop.f32.mrf.mxu0  ;;  %v675_v29 = vpop.f32.mrf.mxu1 }
 0x1ce   : > { %v1906_v31 = vpop.f32.mrf.mxu1  ;;  %849 = vmax.xlane.f32.xlu1 %v848_v30  ;;  %v1900_v32 = vpop.f32.mrf.mxu0 }
 0x1d0   : > { %v712_v33 = vpop.f32.mrf.mxu0  ;;  %v752_v34 = vpop.f32.mrf.mxu1 }
 0x1d1   : > { %v854_v35 = vsel %vm838_vm10, %v752_v34, -inf  ;;  %v851_v36 = vsel %vm838_vm10, %v712_v33, -inf }
 0x1d2   : > { %855 = vmax.xlane.f32.xlu1 %v854_v35  ;;  %v1917_v37 = vpop.f32.mrf.mxu1  ;;  %852 = vmax.xlane.f32.xlu0 %v851_v36  ;;  %v1911_v38 = vpop.f32.mrf.mxu0 }
 0x1d4   : > { %v715_v39 = vpop.f32.mrf.mxu0  ;;  %v755_v40 = vpop.f32.mrf.mxu1 }
 0x1d5   : > { %v2077_v40 = vld [vmem:[%s2614_s2 + $0x38] sm:$0xff]  }
 0x1d6   : > { %v1912_v41 = vpop.f32.mrf.mxu0  ;;  %v1918_v42 = vpop.f32.mrf.mxu1 }
 0x1d7   : > { %v2078_v41 = vld [vmem:[%s2614_s2 + $0xb8] sm:$0xff]   ;;  %v2079_v42 = vld [vmem:[%s2614_s2 + $0x70] sm:$0xff]  }
 0x1d8   : > { %v792_v43 = vpop.f32.mrf.mxu0  ;;  %v832_v44 = vpop.f32.mrf.mxu1 }
 0x1d9   : > { %v860_v45 = vsel %vm838_vm10, %v832_v44, -inf  ;;  %v857_v46 = vsel %vm838_vm10, %v792_v43, -inf }
 0x1da   : > { %861 = vmax.xlane.f32.xlu1 %v860_v45  ;;  %v1929_v47 = vpop.f32.mrf.mxu1  ;;  %858 = vmax.xlane.f32.xlu0 %v857_v46  ;;  %v1923_v48 = vpop.f32.mrf.mxu0  ;;  %v2082_v45 = vld [vmem:[%s2614_s2 + $0x68] sm:$0xff]  }
 0x1db   : > { %v2083_v46 = vld [vmem:[%s2614_s2 + $0x28] sm:$0xff]   ;;  %v2085_v48 = vld [vmem:[%s2614_s2 + $0x60] sm:$0xff]  }
 0x1dc   : > { %v795_v49 = vpop.f32.mrf.mxu0  ;;  %v835_v50 = vpop.f32.mrf.mxu1  ;;  %v2084_v47 = vld [vmem:[%s2614_s2 + $0xa8] sm:$0xff]  }
 0x1dd   : > { %v2086_v49 = vld [vmem:[%s2614_s2 + $0x20] sm:$0xff]  }
 0x1de   : > { %v1924_v51 = vpop.f32.mrf.mxu0  ;;  %v1930_v52 = vpop.f32.mrf.mxu1  ;;  %v2087_v50 = vld [vmem:[%s2614_s2 + $0xa0] sm:$0xff]  }
 0x1df   : > { %v2088_v51 = vld [vmem:[%s2614_s2 + $0x58] sm:$0xff]  }
 0x1e0   : > { %v2089_v52 = vld [vmem:[%s2614_s2 + $0x18] sm:$0xff]  }
 0x24b   : > { %v841_v53 = vpop.xlane.xlu0 %840 }
 0x24c   : > { %v863_v54 = vsub.f32 %v552_v12, %v841_v53  ;;  %v2090_v53 = vld [vmem:[%s2614_s2 + $0x98] sm:$0xff]  }
 0x24e   : > { %v871_v55 = vmul.f32 1.442695, %v863_v54  ;;  %v2091_v54 = vld [vmem:[%s2614_s2 + $0x50] sm:$0xff]  }
 0x24f   : > { %v844_v56 = vpop.xlane.xlu0 %843 }
 0x250   : > { %2100 = vpow2.f32 %v871_v55  ;;  %v864_v57 = vsub.f32 %v592_v13, %v844_v56  ;;  %v2092_v55 = vld [vmem:[%s2614_s2 + $0x10] sm:$0xff]  }
 0x251   : > { %v2093_v56 = vld [vmem:[%s2614_s2 + $0x90] sm:$0xff]  }
 0x252   : > { %v873_v58 = vmul.f32 1.442695, %v864_v57  ;;  %v2094_v57 = vld [vmem:[%s2614_s2 + $0x48] sm:$0xff]  }
 0x253   : > { %v847_v59 = vpop.xlane.xlu1 %846 }
 0x254   : > { %2102 = vpow2.f32 %v873_v58  ;;  %v865_v60 = vsub.f32 %v632_v22, %v847_v59  ;;  %v2095_v58 = vld [vmem:[%s2614_s2 + $0x8] sm:$0xff]  }
 0x255   : > { %v2096_v59 = vld [vmem:[%s2614_s2 + $0x88] sm:$0xff]  }
 0x256   : > { %v875_v61 = vmul.f32 1.442695, %v865_v60  ;;  %v2097_v60 = vld [vmem:[%s2614_s2 + $0x40] sm:$0xff]  }
 0x257   : > { %v850_v62 = vpop.xlane.xlu1 %849 }
 0x258   : > { %2104 = vpow2.f32 %v875_v61  ;;  %v866_v63 = vsub.f32 %v672_v23, %v850_v62  ;;  %v2098_v61 = vld [vmem:[%s2614_s2] sm:$0xff]  }
 0x259   : > { %v2099_v62 = vld [vmem:[%s2614_s2 + $0x80] sm:$0xff]  }
 0x25a   : > { %v877_v0 = vmul.f32 1.442695, %v866_v63 }
 0x25b   : > { %v856_v1 = vpop.xlane.xlu1 %855  ;;  %v853_v2 = vpop.xlane.xlu0 %852 }
 0x25c   : > { %2106 = vpow2.f32 %v877_v0  ;;  %v868_v8 = vsub.f32 %v752_v34, %v856_v1  ;;  %v867_v9 = vsub.f32 %v712_v33, %v853_v2 }
 0x25d   : > { %v2101_v14 = vpop.eup %2100 }
 0x25e   : > { %v881_v12 = vmul.f32 1.442695, %v868_v8  ;;  %v879_v15 = vmul.f32 1.442695, %v867_v9  ;;  %v887_v16 = vsel %vm838_vm10, %v2101_v14, 0.0  ;;  %v911_v13 = vpack.c.bf16 %v2101_v14, %v2101_v14 }
 0x25f   : > { %888 = vadd.xlane.f32.xlu0 %v887_v16 }
 0x260   : > { %2108 = vpow2.f32 %v881_v12  ;;  %1934 = vmatmul.mubr.msk.bf16.vlgmr.msra.gmra.mxu0 %vm838_vm10, %v911_v13 }
 0x261   : > { %v2103_v17 = vpop.eup %2102  ;;  %2110 = vpow2.f32 %v879_v15  ;;  %1944 = vmatpush3.bf16.msra.mxu0 %v2412_v3  ;;  %1945 = vmatprep.mubr.msk.bf16.mxu0 %vm2196_vm0, %v2195_v4 }
 0x262   : > { %v890_v18 = vsel %vm838_vm10, %v2103_v17, 0.0  ;;  %v912_v19 = vpack.c.bf16 %v2103_v17, %v2103_v17  ;;  %1955 = vmatprep.subr.bf16.mxu0 %v2195_v4 }
 0x263   : > { %891 = vadd.xlane.f32.xlu1 %v890_v18  ;;  %v862_v20 = vpop.xlane.xlu1 %861  ;;  %v859_v21 = vpop.xlane.xlu0 %858 }
 0x264   : > { %v870_v22 = vsub.f32 %v832_v44, %v862_v20  ;;  %v869_v23 = vsub.f32 %v792_v43, %v859_v21  ;;  %1940 = vmatmul.mubr.msk.bf16.vlgmr.msra.gmra.mxu1 %vm838_vm10, %v912_v19  ;;  %v2080_v43 = vld [vmem:[%s2614_s2 + $0x30] sm:$0xff]  }
 0x265   : > { %v2105_v24 = vpop.eup %2104  ;;  %1950 = vmatpush3.bf16.msra.mxu1 %v2415_v5  ;;  %1951 = vmatprep.mubr.msk.bf16.mxu1 %vm2196_vm0, %v2195_v4  ;;  %v2081_v44 = vld [vmem:[%s2614_s2 + $0xb0] sm:$0xff]  }
 0x266   : > { %v885_v3 = vmul.f32 1.442695, %v870_v22  ;;  %v883_v25 = vmul.f32 1.442695, %v869_v23  ;;  %v893_v26 = vsel %vm838_vm10, %v2105_v24, 0.0  ;;  %v913_v28 = vpack.c.bf16 %v2105_v24, %v2105_v24  ;;  %1961 = vmatprep.subr.bf16.mxu1 %v2195_v4 }
 0x267   : > { %894 = vadd.xlane.f32.xlu0 %v893_v26 }
 0x268   : > { %1946 = vmatmul.mubr.msk.bf16.vlgmr.msra.gmra.mxu0 %vm838_vm10, %v913_v28  ;;  %2112 = vpow2.f32 %v883_v25 }
 0x269   : > { %v2107_v29 = vpop.eup %2106  ;;  %1956 = vmatpush3.bf16.msra.mxu0 %v2418_v6  ;;  %1957 = vmatprep.mubr.msk.bf16.mxu0 %vm2196_vm0, %v2195_v4  ;;  %2114 = vpow2.f32 %v885_v3 }
 0x26a   : > { %v914_v5 = vpack.c.bf16 %v2107_v29, %v2107_v29  ;;  %1967 = vmatprep.subr.bf16.mxu0 %v2195_v4 }
 0x26c   : > { %1952 = vmatmul.mubr.msk.bf16.vlgmr.msra.gmra.mxu1 %vm838_vm10, %v914_v5 }
 0x26d   : > { %v2109_v30 = vpop.eup %2108  ;;  %1962 = vmatpush3.bf16.msra.mxu1 %v2421_v7  ;;  %1963 = vmatprep.mubr.msk.bf16.mxu1 %vm2196_vm0, %v2195_v4  ;;  %v896_v7 = vsel %vm838_vm10, %v2107_v29, 0.0 }
 0x26e   : > { %v2111_v31 = vpop.eup %2110  ;;  %v902_v32 = vsel %vm838_vm10, %v2109_v30, 0.0  ;;  %1973 = vmatprep.subr.bf16.mxu1 %v2195_v4  ;;  %v916_v34 = vpack.c.bf16 %v2109_v30, %v2109_v30 }
 0x26f   : > { %903 = vadd.xlane.f32.xlu1 %v902_v32  ;;  %v899_v6 = vsel %vm838_vm10, %v2111_v31, 0.0  ;;  %v915_v33 = vpack.c.bf16 %v2111_v31, %v2111_v31 }
 0x270   : > { %900 = vadd.xlane.f32.xlu0 %v899_v6 }
 0x271   : > { %1958 = vmatmul.mubr.msk.bf16.vlgmr.msra.gmra.mxu0 %vm838_vm10, %v915_v33 }
 0x272   : > { %1968 = vmatpush3.bf16.msra.mxu0 %v2426_v10  ;;  %1969 = vmatprep.mubr.msk.bf16.mxu0 %vm2196_vm0, %v2195_v4 }
 0x274   : > { %897 = vadd.xlane.f32.xlu0 %v896_v7  ;;  %1964 = vmatmul.mubr.msk.bf16.vlgmr.msra.gmra.mxu1 %vm838_vm10, %v916_v34 }
 0x275   : > { %1974 = vmatpush3.bf16.msra.mxu1 %v2429_v11  ;;  %1975 = vmatprep.mubr.msk.bf16.mxu1 %vm2196_vm0, %v2195_v4  ;;  %v2113_v35 = vpop.eup %2112  ;;  %v2076_v11 = vld [vmem:[%s2614_s2 + $0x78] sm:$0xff]  }
 0x276   : > { %1979 = vmatprep.subr.bf16.mxu1 %v2195_v4  ;;  %v2115_v36 = vpop.eup %2114  ;;  %v905_v10 = vsel %vm838_vm10, %v2113_v35, 0.0  ;;  %v917_v37 = vpack.c.bf16 %v2113_v35, %v2113_v35  ;;  %1832 = vmatprep.subr.bf16.mxu0 %v2076_v11 }
 0x277   : > { %906 = vadd.xlane.f32.xlu1 %v905_v10  ;;  %v918_v38 = vpack.c.bf16 %v2115_v36, %v2115_v36  ;;  %v908_v39 = vsel %vm838_vm10, %v2115_v36, 0.0 }
 0x279   : > { %1970 = vmatmul.mubr.msk.bf16.vlgmr.msra.gmra.mxu0 %vm838_vm10, %v917_v37 }
 0x27a   : > { %1833 = vmatpush3.bf16.msra.mxu0 %v2077_v40 }
 0x27b   : > { %909 = vadd.xlane.f32.xlu1 %v908_v39  ;;  %1834 = vmatprep.subr.bf16.mxu0 %v2079_v42 }
 0x27c   : > { %1976 = vmatmul.mubr.msk.bf16.vlgmr.msra.gmra.mxu1 %vm838_vm10, %v918_v38 }
 0x27d   : > { %1995 = vmatprep.mubr.msk.bf16.mxu1 %vm2196_vm0, %v2195_v4  ;;  %1980 = vmatpush3.bf16.msra.mxu1 %v2078_v41 }
 0x27e   : > { %1981 = vmatprep.subr.bf16.mxu1 %v2195_v4  ;;  %1835 = vmatpush3.bf16.msra.mxu0 %v2080_v43 }
 0x27f   : > { %1836 = vmatprep.subr.bf16.mxu0 %v2082_v45 }
 0x281   : > { %1982 = vmatpush3.bf16.msra.mxu1 %v2081_v44 }
 0x282   : > { %1983 = vmatprep.subr.bf16.mxu1 %v2195_v4  ;;  %1837 = vmatpush3.bf16.msra.mxu0 %v2083_v46 }
 0x283   : > { %1838 = vmatprep.subr.bf16.mxu0 %v2085_v48 }
 0x285   : > { %1984 = vmatpush3.bf16.msra.mxu1 %v2084_v47 }
 0x286   : > { %1985 = vmatprep.subr.bf16.mxu1 %v2195_v4  ;;  %1839 = vmatpush3.bf16.msra.mxu0 %v2086_v49 }
 0x287   : > { %1840 = vmatprep.subr.bf16.mxu0 %v2088_v51  ;;  %v1311_v51 = vshrl.u32 %v452_v27, 7 }
 0x289   : > { %1986 = vmatpush3.bf16.msra.mxu1 %v2087_v50  ;;  %vm1312_vm11 = vcmp.ge.s32.totalorder %v1311_v51, 1  ;;  %vm1325_vm14 = vcmp.le.s32.totalorder %v1311_v51, 6 }
 0x28a   : > { %1987 = vmatprep.subr.bf16.mxu1 %v2195_v4  ;;  %1841 = vmatpush3.bf16.msra.mxu0 %v2089_v52  ;;  %vm1773_vm15 = vmpackc.low %vm1312_vm11, %vm1312_vm11 }
 0x28b   : > { %1842 = vmatprep.subr.bf16.mxu0 %v2091_v54  ;;  %vm1776_vm0 = vmpackc.low %vm1325_vm14, %vm1325_vm14 }
 0x28d   : > { %1988 = vmatpush3.bf16.msra.mxu1 %v2090_v53 }
 0x28e   : > { %1989 = vmatprep.subr.bf16.mxu1 %v2195_v4  ;;  %1843 = vmatpush3.bf16.msra.mxu0 %v2092_v55 }
 0x28f   : > { %1844 = vmatprep.subr.bf16.mxu0 %v2094_v57 }
 0x291   : > { %1990 = vmatpush3.bf16.msra.mxu1 %v2093_v56 }
 0x292   : > { %1991 = vmatprep.subr.bf16.mxu1 %v2195_v4  ;;  %1845 = vmatpush3.bf16.msra.mxu0 %v2095_v58 }
 0x293   : > { %1846 = vmatprep.subr.bf16.mxu0 %v2097_v60 }
 0x295   : > { %1992 = vmatpush3.bf16.msra.mxu1 %v2096_v59 }
 0x296   : > { %1993 = vmatprep.subr.bf16.mxu1 %v2195_v4  ;;  %1847 = vmatpush3.bf16.msra.mxu0 %v2098_v61 }
 0x299   : > { %1994 = vmatpush3.bf16.msra.mxu1 %v2099_v62 }
 0x2e8   : > { %v889_v63 = vpop.xlane.xlu0 %888 }
 0x2ec   : > { %v892_v0 = vpop.xlane.xlu1 %891 }
 0x2ed   : > { %2116 = vrcp.f32 %v892_v0 }
 0x2ee   : > { %2118 = vrcp.f32 %v889_v63 }
 0x2f0   : > { %v895_v1 = vpop.xlane.xlu0 %894 }
 0x2f1   : > { %2120 = vrcp.f32 %v895_v1 }
 0x2f8   : > { %v904_v8 = vpop.xlane.xlu1 %903 }
 0x2f9   : > { %v901_v9 = vpop.xlane.xlu0 %900  ;;  %2122 = vrcp.f32 %v904_v8 }
 0x2fa   : > { %v2117_v5 = vpop.eup %2116 }
 0x2fb   : > { %v2119_v31 = vpop.eup %2118 }
 0x2fd   : > { %v898_v17 = vpop.xlane.xlu0 %897 }
 0x2fe   : > { %2124 = vrcp.f32 %v898_v17  ;;  %v2121_v33 = vpop.eup %2120  ;;  %v1748_v17 = vld [vmem:[%s2615_s3] ss:$0 sm:$0xff] }
 0x2ff   : > { %2126 = vrcp.f32 %v901_v9 }
 0x300   : > { %v907_v15 = vpop.xlane.xlu1 %906 }
 0x301   : > { %2128 = vrcp.f32 %v907_v15 }
 0x304   : > { %v910_v22 = vpop.xlane.xlu1 %909 }
 0x305   : > { %2130 = vrcp.f32 %v910_v22 }
 0x306   : > { %v2123_v7 = vpop.eup %2122 }
 0x30b   : > { %v2125_v37 = vpop.eup %2124 }
 0x30c   : > { %v2127_v11 = vpop.eup %2126 }
 0x30e   : > { %v2129_v43 = vpop.eup %2128 }
 0x312   : > { %v2131_v52 = vpop.eup %2130 }
 0x320   : > { %v960_v2 = vpop.f32.mrf.mxu0 }
 0x321   : > { %v1296_v35 = vmul.f32 %v2119_v31, %v960_v2 }
 0x322   : > { %v1935_v14 = vpop.f32.mrf.mxu0 }
 0x324   : > { %v963_v12 = vpop.f32.mrf.mxu0  ;;  %v1006_v4 = vpop.f32.mrf.mxu1 }
 0x325   : > { %v1297_v32 = vmul.f32 %v2117_v5, %v1006_v4 }
 0x326   : > { %v1936_v16 = vpop.f32.mrf.mxu0  ;;  %v1941_v13 = vpop.f32.mrf.mxu1 }
 0x327   : > { %v1304_v40 = vadd.f32 %v1297_v32, %v1296_v35 }
 0x328   : > { %v1009_v18 = vpop.f32.mrf.mxu1  ;;  %v1052_v19 = vpop.f32.mrf.mxu0 }
 0x329   : > { %v1298_v36 = vmul.f32 %v2121_v33, %v1052_v19 }
 0x32a   : > { %v1942_v20 = vpop.f32.mrf.mxu1  ;;  %v1947_v21 = vpop.f32.mrf.mxu0 }
 0x32b   : > { %v1306_v46 = vadd.f32 %v1304_v40, %v1298_v36 }
 0x32c   : > { %v1055_v23 = vpop.f32.mrf.mxu0  ;;  %v1098_v24 = vpop.f32.mrf.mxu1 }
 0x32d   : > { %v1299_v41 = vmul.f32 %v2125_v37, %v1098_v24 }
 0x32e   : > { %v1948_v3 = vpop.f32.mrf.mxu0  ;;  %v1953_v25 = vpop.f32.mrf.mxu1 }
 0x32f   : > { %v1308_v53 = vadd.f32 %v1306_v46, %v1299_v41 }
 0x330   : > { %v1101_v26 = vpop.f32.mrf.mxu1 }
 0x331   : > { %v1144_v28 = vpop.f32.mrf.mxu0  ;;  %v1318_v61 = vrot.slane %v1308_v53, 7  ;;  %v1327_v63 = vrot.slane %v1308_v53, 1 }
 0x332   : > { %v1954_v29 = vpop.f32.mrf.mxu1  ;;  %v1300_v44 = vmul.f32 %v2127_v11, %v1144_v28 }
 0x333   : > { %v1959_v30 = vpop.f32.mrf.mxu0 }
 0x334   : > { %v1190_v6 = vpop.f32.mrf.mxu1 }
 0x335   : > { %v1147_v34 = vpop.f32.mrf.mxu0  ;;  %v1301_v38 = vmul.f32 %v2123_v7, %v1190_v6 }
 0x336   : > { %v1965_v10 = vpop.f32.mrf.mxu1 }
 0x337   : > { %v1960_v39 = vpop.f32.mrf.mxu0  ;;  %v1305_v49 = vadd.f32 %v1301_v38, %v1300_v44 }
 0x338   : > { %v1193_v42 = vpop.f32.mrf.mxu1 }
 0x339   : > { %v1236_v45 = vpop.f32.mrf.mxu0 }
 0x33a   : > { %v1302_v47 = vmul.f32 %v2129_v43, %v1236_v45  ;;  %v1966_v48 = vpop.f32.mrf.mxu1 }
 0x33b   : > { %v1971_v50 = vpop.f32.mrf.mxu0 }
 0x33c   : > { %v1282_v54 = vpop.f32.mrf.mxu1  ;;  %v1307_v55 = vadd.f32 %v1305_v49, %v1302_v47 }
 0x33d   : > { %v1239_v56 = vpop.f32.mrf.mxu0  ;;  %v1303_v57 = vmul.f32 %v2131_v52, %v1282_v54 }
 0x33e   : > { %v1977_v58 = vpop.f32.mrf.mxu1 }
 0x33f   : > { %v1309_v59 = vadd.f32 %v1307_v55, %v1303_v57  ;;  %v1972_v60 = vpop.f32.mrf.mxu0 }
 0x340   : > { %v1285_v62 = vpop.f32.mrf.mxu1 }
 0x341   : > { %v1314_v0 = vrot.slane %v1309_v59, 7  ;;  %v1328_v1 = vrot.slane %v1309_v59, 1  ;;  %v1337_v27 = vpack.c.bf16 %v1309_v59, %v1308_v53 }
 0x342   : > { %v1978_v2 = vpop.f32.mrf.mxu1 }
 0x343   : > { %v1319_v8 = vsel %vm1317_vm12, %v1318_v61, %v1314_v0  ;;  %v1322_v9 = vsel %vm1317_vm12, %v1314_v0, %v1318_v61  ;;  %v1329_v14 = vsel %vm1326_vm13, %v1327_v63, %v1328_v1  ;;  %v1333_v12 = vsel %vm1326_vm13, %v1328_v1, %v1327_v63  ;;  %1570 = vmatprep.mubr.bf16.mxu0 %v1337_v27 }
 0x344   : > { %v1774_v4 = vpack.c.bf16 %v1319_v8, %v1322_v9  ;;  %v1777_v15 = vpack.c.bf16 %v1333_v12, %v1329_v14 }
 0x346   : > { %1775 = vmatmul.mubr.msk.bf16.vlgmr.msra.gmra.mxu0 %vm1773_vm15, %v1774_v4  ;;  %1996 = vmatmul.mubr.msk.bf16.vlgmr.msra.gmra.mxu1 %vm1776_vm0, %v1777_v15 }
 0x406   : > { %v1848_v16 = vpop.f32.mrf.mxu0  ;;  %v1613_v13 = vpop.f32.mrf.mxu1 }
 0x408   : > { %v1849_v18 = vpop.f32.mrf.mxu0  ;;  %v1997_v19 = vpop.f32.mrf.mxu1 }
 0x409   : > { %v1850_v20 = vadd.f32 %v1849_v18, %v1848_v16 }
 0x40a   : > { %v1851_v21 = vpop.f32.mrf.mxu0  ;;  %v1616_v22 = vpop.f32.mrf.mxu1 }
 0x40b   : > { %v1573_v23 = vadd.f32 %v1850_v20, %v1748_v17 }
 0x40c   : > { %v1852_v24 = vpop.f32.mrf.mxu0  ;;  %v1998_v3 = vpop.f32.mrf.mxu1 }
 0x40d   : > { %v1614_v25 = vadd.f32 %v1613_v13, %v1573_v23  ;;  %v1853_v26 = vadd.f32 %v1852_v24, %v1851_v21 }
 0x40f   : > { %1620 = vst [vmem:[%s191_s29] sm:$0xff] %v1614_v25  ;;  %v1576_v28 = vadd.f32 %v1853_v26, %v1748_v17 }
 0x411   : > { %v1617_v29 = vadd.f32 %v1616_v22, %v1576_v28 }
 0x413   : > { %1621 = vst [vmem:[%s191_s29 + $0x8] sm:$0xff] %v1617_v29 }
 0x414   : > { %2145 = shalt.err (!%p2142_p3)
}
 0x415   : > { %s2146_s20 = scalar_lea.hbm %s2570_s10, 256  ;;  %s2150_s27 = scalar_lea.hbm %s2616_s4, 512 }
 0x416   : > { %p2147_p4 = scmp.ne.s32.totalorder %s2570_s10, %s2146_s20  ;;  %p2151_p9 = scmp.lt.s32.totalorder %s2570_s10, %s2616_s4 }
 0x417   : > { %p2152_p10 = scmp.lt.s32.totalorder %s2150_s27, %s2146_s20 }
 0x418   : > { %p2148_p7 = pnand %p2147_p4, %p2263_p5 }
 0x419   : > { %p2153_p11 = por %p2152_p10, %p2151_p9 }
 0x41a   : > { %p2149_p8 = pneg %p2148_p7 }
 0x41c   : > { %p2154_p12 = pnand %p2153_p11, %p2149_p8 }
 0x41e   : > { %2157 = shalt.err (!%p2154_p12)
}
 0x41f   : > { %s2198_s5 = smov 128   ;;  %s2199_s29 = smov 8  }
 0x420   : > { %1999 = dma.vmem_to_hbm [thread:$0]  (%p2263_p5), %s2565_s6, 256, %s2570_s10, %s2572_s11, %s2198_s5, %s2198_s5, %s2199_s29  }
 0x421 PF: > { %p2005_p13 = scmp.ge.s32.totalorder %s2192_s18, 2  ;;  %s1651_s7 = sand.u32 1, %s2180_s15  }
 0x422   : > { %s1652_s8 = scalar_lea.sflag [#allocation3], %s1651_s7 }
 0x423   : > { %p2002_p0 = pnand %p2005_p13, %p2267_p6 }
 0x425   : > { %p2003_p1 = pneg %p2002_p0 }
 0x427   : > { %2175 = dma.done.wait (%p2003_p1), %s1652_s8, 256  }
 0x428   : > { %2177 = vsyncadd (%p2003_p1), %s1652_s8, 4294967040  ;;  %p14_p2 = scmp.ge.s32.totalorder %s2250_s21, 4   ;;  %s2619_s15 = smov %s2184_s16 }
 0x429   : > { %s2620_s16 = smov %s2188_s17  ;;  %s2621_s17 = smov %s2261_s24 }
 0x42a   : > { %s2622_s18 = smov %s2250_s21  ;;  %16 = sbr.rel (!%p14_p2) target bundleno = 3 (0x3), region = 71 }
 0x42f   :  { %1657 = vsyncpa [#allocation3], 1 }
 0x430   :  { %1659 = vsyncpa [#allocation3 + $0x1], 1 }

</bundles_post_ra>
